<compile_context>
chip_gen: v6e
topology: v6e:2x2x1
jax: 0.10.0
libtpu: 0.0.40
codegen_flags: <defaults>
</compile_context>

<pallas_src>
import jax
import jax.numpy as jnp
from jax.experimental import pallas as pl
from jax.experimental.pallas import tpu as pltpu


def _round_up(n, m):
    return ((n + m - 1) // m) * m


def fcn_kernel(x_ref, w1_ref, b1_ref, w2_ref, b2_ref, w3_ref, b3_ref, o_ref):
    # x streams in f32; cast to the MXU compute dtype on the VPU (in-kernel).
    x = x_ref[...].astype(w1_ref.dtype)
    # fc1 + ReLU (f32 accumulate, f32 elementwise).
    h1 = jnp.dot(x, w1_ref[...], preferred_element_type=jnp.float32)
    h1 = jnp.maximum(h1 + b1_ref[...], 0.0)
    # fc2 + ReLU
    h2 = jnp.dot(h1.astype(w2_ref.dtype), w2_ref[...],
                 preferred_element_type=jnp.float32)
    h2 = jnp.maximum(h2 + b2_ref[...], 0.0)
    # fc3 + sigmoid
    logits = jnp.dot(h2.astype(w3_ref.dtype), w3_ref[...],
                     preferred_element_type=jnp.float32)
    o_ref[...] = jax.nn.sigmoid(logits + b3_ref[...]).astype(o_ref.dtype)


def prepare_params(params, compute_dtype=jnp.bfloat16):
    """Pre-cast weights to the MXU compute dtype once; biases stay f32."""
    w1, b1, w2, b2, w3, b3 = params
    ws = tuple(w.astype(compute_dtype) for w in (w1, w2, w3))
    bs = tuple(b.astype(jnp.float32) for b in (b1, b2, b3))
    return (ws[0], bs[0], ws[1], bs[1], ws[2], bs[2])


def fcn_forward(x, params, *, compute_dtype=jnp.bfloat16, out_dtype=None,
                block_b=8192):
    """Fused FCN forward pass.  Returns [B, output_dim] in out_dtype."""
    w1, b1, w2, b2, w3, b3 = params
    B, in_dim = x.shape
    h1_dim, h2_dim, out_dim = w1.shape[1], w2.shape[1], w3.shape[1]

    if out_dtype is None:
        out_dtype = (jnp.float32 if jnp.dtype(compute_dtype) == jnp.float32
                     else compute_dtype)

    # No-ops if params were already prepared via prepare_params().
    w1c, w2c, w3c = (w.astype(compute_dtype) for w in (w1, w2, w3))
    b1c, b2c, b3c = (b.astype(jnp.float32) for b in (b1, b2, b3))

    # Batch tile: x ref is f32 so 8-row sublane alignment suffices; use 16 for
    # sub-32-bit compute dtypes (packed-vreg-friendly cast) when B allows.
    # Target >= 4 grid steps for large B (megacore + pipelining), cap at
    # block_b (VMEM safe on all generations at the 8192 default).
    align = 16 if (jnp.dtype(compute_dtype).itemsize < 4 and B >= 16) else 8
    tb = min(block_b, max(align, _round_up(pl.cdiv(B, 4), align)))
    tb = min(tb, _round_up(B, align))
    tb = max(align, (tb // align) * align)
    grid = (pl.cdiv(B, tb),)

    weights = (w1c, b1c, w2c, b2c, w3c, b3c)
    flops = 2 * B * (in_dim * h1_dim + h1_dim * h2_dim + h2_dim * out_dim)
    bytes_accessed = (
        B * in_dim * x.dtype.itemsize                      # x stream (f32)
        + B * out_dim * jnp.dtype(out_dtype).itemsize      # output writeback
        + sum(a.size * a.dtype.itemsize for a in weights)  # resident weights
    )
    cost = pl.CostEstimate(flops=flops,
                           transcendentals=B * out_dim,
                           bytes_accessed=bytes_accessed)

    # Weights/biases pinned in VMEM across all grid steps (constant index_map).
    pinned = lambda a: pl.BlockSpec(a.shape, lambda i: (0,) * a.ndim)

    out = pl.pallas_call(
        fcn_kernel,
        out_shape=jax.ShapeDtypeStruct((B, out_dim), out_dtype),
        grid=grid,
        in_specs=[pl.BlockSpec((tb, in_dim), lambda i: (i, 0)),
                  pinned(w1c), pinned(b1c),
                  pinned(w2c), pinned(b2c),
                  pinned(w3c), pinned(b3c)],
        out_specs=pl.BlockSpec((tb, out_dim), lambda i: (i, 0)),
        compiler_params=pltpu.CompilerParams(
            dimension_semantics=("parallel",)),
        cost_estimate=cost,
    )(x, w1c, b1c, w2c, b2c, w3c, b3c)
    return out


def init_params(key, input_dim, output_dim):
    # Deterministic init mimicking PyTorch nn.Linear default:
    # U(-1/sqrt(fan_in), 1/sqrt(fan_in)) for both weight and bias.
    dims = [(input_dim, 128), (128, 64), (64, output_dim)]
    params = []
    for (fan_in, fan_out) in dims:
        key, kw, kb = jax.random.split(key, 3)
        bound = 1.0 / jnp.sqrt(fan_in)
        w = jax.random.uniform(kw, (fan_in, fan_out), jnp.float32, -bound, bound)
        b = jax.random.uniform(kb, (1, fan_out), jnp.float32, -bound, bound)
        params += [w, b]
    return params


def fcn_reference(x, params):
    w1, b1, w2, b2, w3, b3 = params
    h1 = jnp.maximum(x @ w1 + b1, 0.0)
    h2 = jnp.maximum(h1 @ w2 + b2, 0.0)
    return jax.nn.sigmoid(h2 @ w3 + b3)


if __name__ == "__main__":
    key = jax.random.PRNGKey(0)
    batch, input_dim, output_dim = 8, 32, 4

    kx, kp, kx2 = jax.random.split(key, 3)
    x = jax.random.normal(kx, (batch, input_dim), jnp.float32)
    params = init_params(kp, input_dim, output_dim)
    ref = fcn_reference(x, params)

    # f32 MXU path: tight tolerance against the f32 reference.
    out_f32 = jax.block_until_ready(
        fcn_forward(x, params, compute_dtype=jnp.float32))
    assert out_f32.shape == (batch, output_dim)
    assert out_f32.dtype == jnp.float32
    assert jnp.allclose(out_f32, ref, atol=1e-5, rtol=1e-5)

    # Default bf16-MXU / f32-accumulate path with pre-cast weights:
    # relaxed tolerance (bf16 MXU operands + bf16 output writeback).
    params_bf16 = prepare_params(params, jnp.bfloat16)
    out_bf16 = jax.block_until_ready(fcn_forward(x, params_bf16))
    assert out_bf16.shape == (batch, output_dim)
    assert out_bf16.dtype == jnp.bfloat16
    assert jnp.allclose(out_bf16.astype(jnp.float32), ref, atol=2e-2, rtol=2e-2)

    # Larger, non-tile-multiple batch exercises the multi-step grid and the
    # masked partial last block (no wrapper-side padding pass).
    xl = jax.random.normal(kx2, (1000, input_dim), jnp.float32)
    out_l = jax.block_until_ready(fcn_forward(xl, params_bf16))
    ref_l = fcn_reference(xl, params)
    assert out_l.shape == (1000, output_dim)
    out_l32 = out_l.astype(jnp.float32)
    assert jnp.all(jnp.isfinite(out_l32))          # partial block is clean
    assert jnp.allclose(out_l32, ref_l, atol=2e-2, rtol=2e-2)
    # Explicitly check the rows living in the partial last block.
    assert jnp.allclose(out_l32[-16:], ref_l[-16:], atol=2e-2, rtol=2e-2)

    print("KERNEL_OK")
</pallas_src>

<mosaic_0001>
module attributes {stable_mosaic.version = 11 : i64} {
  func.func @fcn_kernel(%arg0: i32, %arg1: memref<8x32xf32, #tpu.memory_space<vmem>>, %arg2: memref<32x128xf32, #tpu.memory_space<vmem>>, %arg3: memref<1x128xf32, #tpu.memory_space<vmem>>, %arg4: memref<128x64xf32, #tpu.memory_space<vmem>>, %arg5: memref<1x64xf32, #tpu.memory_space<vmem>>, %arg6: memref<64x4xf32, #tpu.memory_space<vmem>>, %arg7: memref<1x4xf32, #tpu.memory_space<vmem>>, %arg8: memref<8x4xf32, #tpu.memory_space<vmem>>) attributes {dimension_semantics = [#tpu.dimension_semantics<parallel>], iteration_bounds = array<i64: 1>, scalar_prefetch = 0 : i64, scratch_operands = 0 : i64, tpu.core_type = #tpu.core_type<tc>, window_params = [{transform_indices = @transform_0, window_bounds = array<i64: 8, 32>}, {pipeline_mode = #tpu.pipeline_mode<synchronous>, transform_indices = @transform_1, window_bounds = array<i64: 32, 128>}, {pipeline_mode = #tpu.pipeline_mode<synchronous>, transform_indices = @transform_2, window_bounds = array<i64: 1, 128>}, {pipeline_mode = #tpu.pipeline_mode<synchronous>, transform_indices = @transform_3, window_bounds = array<i64: 128, 64>}, {pipeline_mode = #tpu.pipeline_mode<synchronous>, transform_indices = @transform_4, window_bounds = array<i64: 1, 64>}, {pipeline_mode = #tpu.pipeline_mode<synchronous>, transform_indices = @transform_5, window_bounds = array<i64: 64, 4>}, {pipeline_mode = #tpu.pipeline_mode<synchronous>, transform_indices = @transform_6, window_bounds = array<i64: 1, 4>}, {transform_indices = @transform_7, window_bounds = array<i64: 8, 4>}]} {
    %c0 = arith.constant 0 : index
    %c0_0 = arith.constant 0 : index
    %0 = vector.load %arg1[%c0, %c0_0] : memref<8x32xf32, #tpu.memory_space<vmem>>, vector<8x32xf32>
    %c0_1 = arith.constant 0 : index
    %c0_2 = arith.constant 0 : index
    %1 = vector.load %arg2[%c0_1, %c0_2] : memref<32x128xf32, #tpu.memory_space<vmem>>, vector<32x128xf32>
    %cst = arith.constant dense<0.000000e+00> : vector<8x128xf32>
    %2 = tpu.matmul %0, %1, %cst {dimension_numbers = #tpu.dot_dimension_numbers<[1], [0], [0], [1], [0, 0, 1, 1], [], []>} : vector<8x32xf32>, vector<32x128xf32>, vector<8x128xf32> -> vector<8x128xf32>
    %c0_3 = arith.constant 0 : index
    %c0_4 = arith.constant 0 : index
    %3 = vector.load %arg3[%c0_3, %c0_4] : memref<1x128xf32, #tpu.memory_space<vmem>>, vector<1x128xf32>
    %4 = vector.broadcast %3 : vector<1x128xf32> to vector<8x128xf32>
    %5 = arith.addf %2, %4 : vector<8x128xf32>
    %cst_5 = arith.constant 0.000000e+00 : f32
    %6 = vector.broadcast %cst_5 : f32 to vector<8x128xf32>
    %7 = arith.maximumf %5, %6 : vector<8x128xf32>
    %c0_6 = arith.constant 0 : index
    %c0_7 = arith.constant 0 : index
    %8 = vector.load %arg4[%c0_6, %c0_7] : memref<128x64xf32, #tpu.memory_space<vmem>>, vector<128x64xf32>
    %cst_8 = arith.constant dense<0.000000e+00> : vector<8x64xf32>
    %9 = tpu.matmul %7, %8, %cst_8 {dimension_numbers = #tpu.dot_dimension_numbers<[1], [0], [0], [1], [0, 0, 1, 1], [], []>} : vector<8x128xf32>, vector<128x64xf32>, vector<8x64xf32> -> vector<8x64xf32>
    %c0_9 = arith.constant 0 : index
    %c0_10 = arith.constant 0 : index
    %10 = vector.load %arg5[%c0_9, %c0_10] : memref<1x64xf32, #tpu.memory_space<vmem>>, vector<1x64xf32>
    %11 = vector.broadcast %10 : vector<1x64xf32> to vector<8x64xf32>
    %12 = arith.addf %9, %11 : vector<8x64xf32>
    %cst_11 = arith.constant 0.000000e+00 : f32
    %13 = vector.broadcast %cst_11 : f32 to vector<8x64xf32>
    %14 = arith.maximumf %12, %13 : vector<8x64xf32>
    %c0_12 = arith.constant 0 : index
    %c0_13 = arith.constant 0 : index
    %15 = vector.load %arg6[%c0_12, %c0_13] : memref<64x4xf32, #tpu.memory_space<vmem>>, vector<64x4xf32>
    %cst_14 = arith.constant dense<0.000000e+00> : vector<8x4xf32>
    %16 = tpu.matmul %14, %15, %cst_14 {dimension_numbers = #tpu.dot_dimension_numbers<[1], [0], [0], [1], [0, 0, 1, 1], [], []>} : vector<8x64xf32>, vector<64x4xf32>, vector<8x4xf32> -> vector<8x4xf32>
    %c0_15 = arith.constant 0 : index
    %c0_16 = arith.constant 0 : index
    %17 = vector.load %arg7[%c0_15, %c0_16] : memref<1x4xf32, #tpu.memory_space<vmem>>, vector<1x4xf32>
    %18 = vector.broadcast %17 : vector<1x4xf32> to vector<8x4xf32>
    %19 = arith.addf %16, %18 : vector<8x4xf32>
    %20 = arith.negf %19 : vector<8x4xf32>
    %21 = math.exp %20 : vector<8x4xf32>
    %cst_17 = arith.constant 1.000000e+00 : f32
    %22 = vector.broadcast %cst_17 : f32 to vector<8x4xf32>
    %23 = arith.addf %22, %21 : vector<8x4xf32>
    %24 = arith.divf %22, %23 : vector<8x4xf32>
    %c0_18 = arith.constant 0 : index
    %c0_19 = arith.constant 0 : index
    %25 = vector.load %arg8[%c0_18, %c0_19] : memref<8x4xf32, #tpu.memory_space<vmem>>, vector<8x4xf32>
    tpu.vector_store %arg8[%c0_18, %c0_19], %24 {strides = array<i32>} : memref<8x4xf32, #tpu.memory_space<vmem>>, vector<8x4xf32>,
    return
  }
  func.func @transform_0(%arg0: i32) -> (i32, i32) {
    %c0_i32 = arith.constant 0 : i32
    %c0_i32_0 = arith.constant 0 : i32
    return %arg0, %c0_i32 : i32, i32
  }
  func.func @transform_1(%arg0: i32) -> (i32, i32) {
    %c0_i32 = arith.constant 0 : i32
    %c0_i32_0 = arith.constant 0 : i32
    %c0_i32_1 = arith.constant 0 : i32
    return %c0_i32, %c0_i32_0 : i32, i32
  }
  func.func @transform_2(%arg0: i32) -> (i32, i32) {
    %c0_i32 = arith.constant 0 : i32
    %c0_i32_0 = arith.constant 0 : i32
    %c0_i32_1 = arith.constant 0 : i32
    return %c0_i32, %c0_i32_0 : i32, i32
  }
  func.func @transform_3(%arg0: i32) -> (i32, i32) {
    %c0_i32 = arith.constant 0 : i32
    %c0_i32_0 = arith.constant 0 : i32
    %c0_i32_1 = arith.constant 0 : i32
    return %c0_i32, %c0_i32_0 : i32, i32
  }
  func.func @transform_4(%arg0: i32) -> (i32, i32) {
    %c0_i32 = arith.constant 0 : i32
    %c0_i32_0 = arith.constant 0 : i32
    %c0_i32_1 = arith.constant 0 : i32
    return %c0_i32, %c0_i32_0 : i32, i32
  }
  func.func @transform_5(%arg0: i32) -> (i32, i32) {
    %c0_i32 = arith.constant 0 : i32
    %c0_i32_0 = arith.constant 0 : i32
    %c0_i32_1 = arith.constant 0 : i32
    return %c0_i32, %c0_i32_0 : i32, i32
  }
  func.func @transform_6(%arg0: i32) -> (i32, i32) {
    %c0_i32 = arith.constant 0 : i32
    %c0_i32_0 = arith.constant 0 : i32
    %c0_i32_1 = arith.constant 0 : i32
    return %c0_i32, %c0_i32_0 : i32, i32
  }
  func.func @transform_7(%arg0: i32) -> (i32, i32) {
    %c0_i32 = arith.constant 0 : i32
    %c0_i32_0 = arith.constant 0 : i32
    return %arg0, %c0_i32 : i32, i32
  }
}

</mosaic_0001>

<bundles_post_ra>
// kernel: tpu_custom_call.1
= control target key start
LH: loop header
LB: loop body
LE: loop exit
PB: predicated region body
PF: predicated region fallthrough
CT: control target
= control target key end

     0   :  { %v416_v0 = vmov 0.0   ;;  %vm417_vm0 = vmmov 0   ;;  %vm38_vm1 = vcmask 261120   ;;  %vm222_vm2 = vcmask 523264   ;;  %s591_s1 = inlined_call_operand.vmem [shape: f32[32,128], index: 1, kind: input, shape index: {}]   ;;  %s592_s3 = inlined_call_operand.vmem [shape: f32[128,64], index: 3, kind: input, shape index: {}]   ;;  %s593_s0 = inlined_call_operand.vmem [shape: f32[8,32], index: 0, kind: input, shape index: {}]   ;;  %s594_s5 = inlined_call_operand.vmem [shape: f32[64,4], index: 5, kind: input, shape index: {}]   ;;  %s595_s2 = inlined_call_operand.vmem [shape: f32[1,128], index: 2, kind: input, shape index: {}]   ;;  %s596_s4 = inlined_call_operand.vmem [shape: f32[1,64], index: 4, kind: input, shape index: {}]   ;;  %s597_s6 = inlined_call_operand.vmem [shape: f32[1,4], index: 6, kind: input, shape index: {}]   ;;  %s598_s7 = inlined_call_operand.vmem [shape: f32[8,4], index: 7, kind: output, shape index: {}]  }
   0x1   :  { %345 = vmatprep.subr.mxu0 %v416_v0  ;;  %v30_v1 = vld [vmem:[%s591_s1 + $0x18] sm:$0xff]  ;;  %v29_v2 = vld [vmem:[%s591_s1 + $0x10] sm:$0xff]  ;;  %353 = vmatprep.mubr.msk.f32.mxu0 %vm417_vm0, %v416_v0  ;;  %v28_v4 = vld [vmem:[%s591_s1 + $0x8] sm:$0xff]  ;;  %vm302_vm3 = vcmask 31744  }
   0x2   :  { %346 = vmatpush3.msra.mxu0 %v30_v1  ;;  %356 = vmatprep.subr.mxu1 %v416_v0  ;;  %v128_v3 = vld [vmem:[%s592_s3 + $0x78] sm:$0xff]  ;;  %v127_v5 = vld [vmem:[%s592_s3 + $0x70] sm:$0xff]  ;;  %v126_v6 = vld [vmem:[%s592_s3 + $0x68] sm:$0xff] }
   0x3   :  { %347 = vmatprep.subr.mxu0 %v416_v0  ;;  %357 = vmatpush3.msra.mxu1 %v128_v3  ;;  %v27_v7 = vld [vmem:[%s591_s1] sm:$0xff]  ;;  %v124_v10 = vld [vmem:[%s592_s3 + $0x58] sm:$0xff]  ;;  %v123_v11 = vld [vmem:[%s592_s3 + $0x50] sm:$0xff] }
   0x4   :  { %348 = vmatpush3.msra.mxu0 %v29_v2  ;;  %358 = vmatprep.subr.mxu1 %v416_v0  ;;  %v26_v8 = vld [vmem:[%s593_s0] sm:$0xff]  ;;  %v122_v12 = vld [vmem:[%s592_s3 + $0x48] sm:$0xff]  ;;  %v120_v14 = vld [vmem:[%s592_s3 + $0x38] sm:$0xff] }
   0x5   :  { %349 = vmatprep.subr.mxu0 %v416_v0  ;;  %359 = vmatpush3.msra.mxu1 %v127_v5  ;;  %v125_v9 = vld [vmem:[%s592_s3 + $0x60] sm:$0xff]  ;;  %v119_v15 = vld [vmem:[%s592_s3 + $0x30] sm:$0xff]  ;;  %v118_v16 = vld [vmem:[%s592_s3 + $0x28] sm:$0xff] }
   0x6   :  { %350 = vmatpush3.msra.mxu0 %v28_v4  ;;  %360 = vmatprep.subr.mxu1 %v416_v0  ;;  %v121_v13 = vld [vmem:[%s592_s3 + $0x40] sm:$0xff]  ;;  %v116_v18 = vld [vmem:[%s592_s3 + $0x18] sm:$0xff]  ;;  %v115_v19 = vld [vmem:[%s592_s3 + $0x10] sm:$0xff] }
   0x7   :  { %351 = vmatprep.subr.mxu0 %v416_v0  ;;  %361 = vmatpush3.msra.mxu1 %v126_v6  ;;  %v117_v17 = vld [vmem:[%s592_s3 + $0x20] sm:$0xff]  ;;  %v114_v20 = vld [vmem:[%s592_s3 + $0x8] sm:$0xff]  ;;  %v214_v22 = vld [vmem:[%s594_s5 + $0x38] sm:$0xff] }
   0x8   :  { %352 = vmatpush3.msra.mxu0 %v27_v7  ;;  %362 = vmatprep.subr.mxu1 %v416_v0  ;;  %v113_v21 = vld [vmem:[%s592_s3] sm:$0xff]  ;;  %v213_v23 = vld [vmem:[%s594_s5 + $0x30] sm:$0xff]  ;;  %v212_v24 = vld [vmem:[%s594_s5 + $0x28] sm:$0xff] }
   0x9   :  { %354 = vmatmul.mubr.msk.f32.vlgmr.msra.gmra.mxu0 %vm38_vm1, %v26_v8  ;;  %363 = vmatpush3.msra.mxu1 %v125_v9  ;;  %v211_v25 = vld [vmem:[%s594_s5 + $0x20] sm:$0xff]  ;;  %v210_v26 = vld [vmem:[%s594_s5 + $0x18] sm:$0xff]  ;;  %v209_v32 = vld [vmem:[%s594_s5 + $0x10] sm:$0xff] }
   0xa   :  { %364 = vmatprep.subr.mxu1 %v416_v0  ;;  %388 = vmatprep.mubr.msk.f32.mxu1 %vm417_vm0, %v416_v0  ;;  %v308_v27 = vld [vmem:[%s595_s2] ss:$0 sm:$0xff]  ;;  %v208_v33 = vld [vmem:[%s594_s5 + $0x8] sm:$0xff] }
   0xb   :  { %365 = vmatpush3.msra.mxu1 %v124_v10  ;;  %391 = vmatprep.subr.mxu0 %v416_v0  ;;  %v207_v34 = vld [vmem:[%s594_s5] sm:$0xff] }
   0xc   :  { %366 = vmatprep.subr.mxu1 %v416_v0  ;;  %407 = vmatprep.mubr.msk.f32.mxu0 %vm417_vm0, %v416_v0  ;;  %v310_v35 = vld [vmem:[%s596_s4] ss:$0 sm:$0xff] }
   0xd   :  { %367 = vmatpush3.msra.mxu1 %v123_v11  ;;  %392 = vmatpush3.msra.mxu0 %v214_v22  ;;  %v311_v40 = vld [vmem:[%s597_s6] ss:$0 sm:$0xff] }
   0xe   :  { %368 = vmatprep.subr.mxu1 %v416_v0  ;;  %393 = vmatprep.subr.mxu0 %v416_v0 }
   0xf   :  { %369 = vmatpush3.msra.mxu1 %v122_v12  ;;  %394 = vmatpush3.msra.mxu0 %v213_v23 }
  0x10   :  { %370 = vmatprep.subr.mxu1 %v416_v0  ;;  %395 = vmatprep.subr.mxu0 %v416_v0 }
  0x11   :  { %371 = vmatpush3.msra.mxu1 %v121_v13  ;;  %396 = vmatpush3.msra.mxu0 %v212_v24 }
  0x12   :  { %372 = vmatprep.subr.mxu1 %v416_v0  ;;  %397 = vmatprep.subr.mxu0 %v416_v0 }
  0x13   :  { %373 = vmatpush3.msra.mxu1 %v120_v14  ;;  %398 = vmatpush3.msra.mxu0 %v211_v25 }
  0x14   :  { %374 = vmatprep.subr.mxu1 %v416_v0  ;;  %399 = vmatprep.subr.mxu0 %v416_v0 }
  0x15   :  { %375 = vmatpush3.msra.mxu1 %v119_v15  ;;  %400 = vmatpush3.msra.mxu0 %v210_v26 }
  0x16   :  { %376 = vmatprep.subr.mxu1 %v416_v0  ;;  %401 = vmatprep.subr.mxu0 %v416_v0 }
  0x17   :  { %377 = vmatpush3.msra.mxu1 %v118_v16  ;;  %402 = vmatpush3.msra.mxu0 %v209_v32 }
  0x18   :  { %378 = vmatprep.subr.mxu1 %v416_v0  ;;  %403 = vmatprep.subr.mxu0 %v416_v0 }
  0x19   :  { %379 = vmatpush3.msra.mxu1 %v117_v17  ;;  %404 = vmatpush3.msra.mxu0 %v208_v33 }
  0x1a   :  { %380 = vmatprep.subr.mxu1 %v416_v0  ;;  %405 = vmatprep.subr.mxu0 %v416_v0 }
  0x1b   :  { %381 = vmatpush3.msra.mxu1 %v116_v18  ;;  %406 = vmatpush3.msra.mxu0 %v207_v34 }
  0x1c   :  { %382 = vmatprep.subr.mxu1 %v416_v0 }
  0x1d   :  { %383 = vmatpush3.msra.mxu1 %v115_v19 }
  0x1e   :  { %384 = vmatprep.subr.mxu1 %v416_v0 }
  0x1f   :  { %385 = vmatpush3.msra.mxu1 %v114_v20 }
  0x20   :  { %386 = vmatprep.subr.mxu1 %v416_v0 }
  0x21   :  { %387 = vmatpush3.msra.mxu1 %v113_v21 }
  0xc9   :  { %v108_v28 = vpop.f32.mrf.mxu0 }
  0xca   :  { %v109_v29 = vadd.f32 %v308_v27, %v108_v28 }
  0xcb   :  { %v355_v30 = vpop.f32.mrf.mxu0 }
  0xcc   :  { %v112_v31 = vmax.f32 %v109_v29, 0.0 }
  0xce   :  { %389 = vmatmul.mubr.f32.vlgmr.msra.gmra.mxu1 %v112_v31 }
 0x18e   :  { %v202_v36 = vpop.f32.mrf.mxu1 }
 0x18f   :  { %v203_v37 = vadd.f32 %v310_v35, %v202_v36 }
 0x190   :  { %v390_v38 = vpop.f32.mrf.mxu1 }
 0x191   :  { %v206_v39 = vmax.f32 %v203_v37, 0.0 }
 0x193   :  { %408 = vmatmul.mubr.msk.f32.vlgmr.msra.gmra.mxu0 %vm222_vm2, %v206_v39 }
 0x253   :  { %v292_v41 = vpop.f32.mrf.mxu0 }
 0x254   :  { %v293_v42 = vadd.f32 %v311_v40, %v292_v41 }
 0x255   :  { %v409_v43 = vpop.f32.mrf.mxu0 }
 0x256   :  { %v313_v44 = vmul.f32 -1.442695, %v293_v42 }
 0x258   :  { %412 = vpow2.f32 %v313_v44 }
 0x265   :  { %v413_v45 = vpop.eup %412 }
 0x266   :  { %v299_v46 = vadd.f32 1.0, %v413_v45 }
 0x268   :  { %414 = vrcp.f32 %v299_v46 }
 0x275   :  { %v415_v47 = vpop.eup %414 }
 0x276   :  { %303 = vst.msk [vmem:[%s598_s7] sm:$0xff] %vm302_vm3, %v415_v47 }

</bundles_post_ra>
